<compile_context>
chip_gen: v6e
topology: v6e:2x2x1
jax: 0.10.0
libtpu: 0.0.40
codegen_flags: <defaults>
</compile_context>

<pallas_src>
import functools
from typing import NamedTuple, Optional

import jax
import jax.numpy as jnp
from jax.experimental import pallas as pl
from jax.experimental.pallas import tpu as pltpu


def _round_up(x, m):
    return (x + m - 1) // m * m


def _cdiv(a, b):
    return -(-a // b)


# -----------------------------------------------------------------------------
# Kernel: one batch tile, all three layers fused, weights VMEM-resident.
# -----------------------------------------------------------------------------
def _mlp_readout_kernel(x_ref, w0_ref, b0_ref, w1_ref, b1_ref, w2_ref, b2_ref,
                        o_ref, *, mxu_dtype=None):
    compute_dtype = jnp.dtype(jnp.float32 if mxu_dtype is None else mxu_dtype)

    def dense(y, w_ref, b_ref):
        # Weights already stored in `compute_dtype` (cast once at prep time);
        # only the activations may need a cast here (no per-step weight cast).
        if y.dtype != compute_dtype:
            y = y.astype(compute_dtype)
        # MXU matmul with f32 accumulation; bias add / ReLU stay in f32.
        return jnp.dot(y, w_ref[...], preferred_element_type=jnp.float32) + b_ref[...]

    y = x_ref[...]                                   # no unconditional up-cast
    y = jnp.maximum(dense(y, w0_ref, b0_ref), 0.0)   # layer 0: Linear + ReLU
    y = jnp.maximum(dense(y, w1_ref, b1_ref), 0.0)   # layer 1: Linear + ReLU
    y = dense(y, w2_ref, b2_ref)                     # layer 2: Linear
    o_ref[...] = y.astype(o_ref.dtype)


# -----------------------------------------------------------------------------
# One-time parameter preparation (padding + casting happen here, NOT per call).
# -----------------------------------------------------------------------------
class PreparedMLPReadoutParams(NamedTuple):
    w0: jax.Array
    b0: jax.Array
    w1: jax.Array
    b1: jax.Array
    w2: jax.Array
    b2: jax.Array
    d_out: int                    # un-padded output dim (static metadata)
    mxu_dtype: Optional[object]   # dtype for MXU operands, or None (exact f32)


def prepare_mlp_readout_params(params, *, mxu_dtype=None):
    """Pad hidden/output dims to multiples of 128 and cast weights once.

    `params` = (w0, b0, w1, b1, w2, b2) with weights stored as [in, out].
    Zero padding is exact through bias-add(0) + ReLU; padded output columns
    are sliced off after the kernel.
    """
    w0, b0, w1, b1, w2, b2 = params
    b0 = jnp.reshape(b0, (1, -1))
    b1 = jnp.reshape(b1, (1, -1))
    b2 = jnp.reshape(b2, (1, -1))

    d_h0, d_h1, d_out = w0.shape[1], w1.shape[1], w2.shape[1]
    d_h0_p = _round_up(d_h0, 128)
    d_h1_p = _round_up(d_h1, 128)
    d_out_p = _round_up(d_out, 128)

    w_dtype = jnp.dtype(jnp.float32 if mxu_dtype is None else mxu_dtype)

    w0 = jnp.pad(w0, ((0, 0), (0, d_h0_p - d_h0))).astype(w_dtype)
    w1 = jnp.pad(w1, ((0, d_h0_p - d_h0), (0, d_h1_p - d_h1))).astype(w_dtype)
    w2 = jnp.pad(w2, ((0, d_h1_p - d_h1), (0, d_out_p - d_out))).astype(w_dtype)
    # Biases stay f32: the bias/ReLU epilogue runs in f32 (v5e has no bf16 VPU).
    b0 = jnp.pad(b0, ((0, 0), (0, d_h0_p - d_h0))).astype(jnp.float32)
    b1 = jnp.pad(b1, ((0, 0), (0, d_h1_p - d_h1))).astype(jnp.float32)
    b2 = jnp.pad(b2, ((0, 0), (0, d_out_p - d_out))).astype(jnp.float32)

    return PreparedMLPReadoutParams(w0, b0, w1, b1, w2, b2, d_out, mxu_dtype)


# -----------------------------------------------------------------------------
# Jitted wrapper around pallas_call.
# -----------------------------------------------------------------------------
@functools.partial(
    jax.jit,
    static_argnames=("d_out", "tm", "mxu_dtype", "single_buffer_weights"))
def _mlp_readout_impl(x, w0, b0, w1, b1, w2, b2, *, d_out, tm, mxu_dtype,
                      single_buffer_weights):
    n, d_in = x.shape
    d_h0_p = w0.shape[1]
    d_h1_p = w1.shape[1]
    d_out_p = w2.shape[1]

    # ---- Batch tiling --------------------------------------------------------
    # Pad only to the 8-row sublane quantum; pick tile_m so tiles are <= tm,
    # there are >=2 grid steps whenever n >= 16 rows (overlap + both v7x TCs),
    # and tile_m divides the padded batch (waste bounded, never ~2x like
    # rounding n up to a multiple of tm).
    tm = _round_up(max(tm, 8), 8)              # guard: tm must be 8-aligned
    n_8 = _round_up(n, 8)
    min_steps = 2 if n_8 >= 16 else 1
    num_tiles = max(_cdiv(n_8, tm), min_steps)
    tile_m = _round_up(_cdiv(n_8, num_tiles), 8)
    n_p = _round_up(n_8, tile_m)
    grid = (n_p // tile_m,)

    if n_p != n:
        x = jnp.pad(x, ((0, n_p - n), (0, 0)))

    # ---- Explicit VMEM budget (matters on v7x: 64 MiB phys / 32 MiB scoped) --
    isz = lambda a: jnp.dtype(a.dtype).itemsize
    x_buf = 2 * tile_m * d_in * isz(x)                       # double-buffered in
    o_buf = 2 * tile_m * d_out_p * isz(x)                    # double-buffered out
    w_copies = 1 if single_buffer_weights else 2
    w_buf = w_copies * (w0.size * isz(w0) + w1.size * isz(w1) + w2.size * isz(w2)
                        + 4 * (b0.size + b1.size + b2.size))
    act_buf = 3 * tile_m * max(d_h0_p, d_h1_p, d_out_p) * 4  # f32 intermediates
    needed = int(1.5 * (x_buf + o_buf + w_buf + act_buf)) + (1 << 20)
    # Never drop below the common 32 MiB scoped default; stay under physical.
    # TODO(synk): on v7x at realistic d_in, shrink tile_m (or K-tile layer 0)
    # when `needed` exceeds ~48 MiB instead of just clamping the limit.
    vmem_limit = min(max(needed, 32 << 20), 96 << 20)

    # ---- BlockSpecs ----------------------------------------------------------
    def weight_spec(shape):
        if single_buffer_weights:
            # Grid-invariant operands: the default second pipeline buffer is
            # dead weight; single-buffer them to halve weight VMEM residency.
            return pl.BlockSpec(shape, lambda i: (0, 0),
                                pipeline_mode=pl.Buffered(1))
        return pl.BlockSpec(shape, lambda i: (0, 0))

    out_p = pl.pallas_call(
        functools.partial(_mlp_readout_kernel, mxu_dtype=mxu_dtype),
        out_shape=jax.ShapeDtypeStruct((n_p, d_out_p), x.dtype),
        grid_spec=pl.GridSpec(
            grid=grid,
            in_specs=[
                pl.BlockSpec((tile_m, d_in), lambda i: (i, 0)),  # x tile
                weight_spec((d_in, d_h0_p)),                     # w0 (padded)
                weight_spec((1, d_h0_p)),                        # b0 (padded)
                weight_spec((d_h0_p, d_h1_p)),                   # w1 (padded)
                weight_spec((1, d_h1_p)),                        # b1 (padded)
                weight_spec((d_h1_p, d_out_p)),                  # w2 (padded)
                weight_spec((1, d_out_p)),                       # b2 (padded)
            ],
            out_specs=pl.BlockSpec((tile_m, d_out_p), lambda i: (i, 0)),
        ),
        compiler_params=pltpu.CompilerParams(
            dimension_semantics=("parallel",),
            vmem_limit_bytes=vmem_limit),
    )(x, w0, b0, w1, b1, w2, b2)

    # Strip batch padding and the lane padding of the final layer.
    # TODO(synk): when the consumer can take the (n, 128) slab directly,
    # skip this slice (extra HBM pass that matters at tiny d_out).
    return out_p[:n, :d_out]


def mlp_readout(x, prepared: PreparedMLPReadoutParams, *, tm=512):
    """Forward pass of MLPReadout. `prepared` from prepare_mlp_readout_params.

    tm: max rows per batch tile (8-aligned). Default 512 fits all generations;
    on v6e (128 MiB VMEM) it can be raised to 1024-2048 for large batches.
    """
    args = (x, prepared.w0, prepared.b0, prepared.w1, prepared.b1,
            prepared.w2, prepared.b2)
    kwargs = dict(d_out=prepared.d_out, tm=tm, mxu_dtype=prepared.mxu_dtype)
    try:
        return _mlp_readout_impl(*args, single_buffer_weights=True, **kwargs)
    except Exception:
        # Fallback if this jax/libtpu build rejects pl.Buffered(1) on a
        # top-level pallas_call BlockSpec: default double-buffering is still
        # correct, it just keeps 2x weight VMEM residency.
        return _mlp_readout_impl(*args, single_buffer_weights=False, **kwargs)


# -----------------------------------------------------------------------------
# Synthetic init + pure-JAX reference (matches the PyTorch module's shapes).
# -----------------------------------------------------------------------------
def init_mlp_readout_params(key, input_dim, output_dim, L=2, dtype=jnp.float32):
    """Layer l: Linear(input_dim // 2**l -> input_dim // 2**(l+1)); final layer
    Linear(input_dim // 2**L -> output_dim).  Weights returned as [in, out]."""
    dims = [input_dim // (2 ** l) for l in range(L + 1)] + [output_dim]
    params = []
    for l in range(L + 1):
        d_in, d_o = dims[l], dims[l + 1]
        key, kw, kb = jax.random.split(key, 3)
        bound = 1.0 / (d_in ** 0.5)
        w = jax.random.uniform(kw, (d_in, d_o), dtype, -bound, bound)
        b = jax.random.uniform(kb, (1, d_o), dtype, -bound, bound)
        params.extend([w, b])
    return tuple(params)


def mlp_readout_reference(x, params):
    (w0, b0, w1, b1, w2, b2) = params
    y = jnp.maximum(x @ w0 + b0, 0.0)
    y = jnp.maximum(y @ w1 + b1, 0.0)
    return y @ w2 + b2


if __name__ == "__main__":
    input_dim = 32
    output_dim = 4
    batch = 64

    key = jax.random.PRNGKey(0)
    kx, kp = jax.random.split(key)
    x = jax.random.normal(kx, (batch, input_dim), jnp.float32)
    params = init_mlp_readout_params(kp, input_dim, output_dim, L=2)

    # Exact f32 path.
    prepared = prepare_mlp_readout_params(params)
    out = jax.block_until_ready(mlp_readout(x, prepared))
    ref = mlp_readout_reference(x, params)
    assert out.shape == (batch, output_dim)
    assert jnp.allclose(out, ref, atol=1e-5, rtol=1e-5), "mismatch vs reference"

    # Batch not a multiple of 8 / of the tile (sublane-only padding path).
    x_odd = jax.random.normal(kx, (37, input_dim), jnp.float32)
    out_odd = jax.block_until_ready(mlp_readout(x_odd, prepared))
    ref_odd = mlp_readout_reference(x_odd, params)
    assert out_odd.shape == (37, output_dim)
    assert jnp.allclose(out_odd, ref_odd, atol=1e-5, rtol=1e-5), "mismatch (odd batch)"

    # bf16 MXU operands (weights pre-cast once at prep time).  This
    # intentionally changes numerics vs the f32 reference -> loose tolerance.
    prepared_bf16 = prepare_mlp_readout_params(params, mxu_dtype=jnp.bfloat16)
    out_bf16 = jax.block_until_ready(mlp_readout(x, prepared_bf16))
    assert out_bf16.shape == (batch, output_dim)
    assert jnp.allclose(out_bf16, ref, atol=1e-1, rtol=1e-1), "mismatch (bf16 MXU)"

    print("KERNEL_OK")
</pallas_src>

<mosaic_0001>
module attributes {stable_mosaic.version = 11 : i64} {
  func.func @_mlp_readout_kernel(%arg0: i32, %arg1: memref<32x32xf32, #tpu.memory_space<vmem>>, %arg2: memref<32x128xf32, #tpu.memory_space<vmem>>, %arg3: memref<1x128xf32, #tpu.memory_space<vmem>>, %arg4: memref<128x128xf32, #tpu.memory_space<vmem>>, %arg5: memref<1x128xf32, #tpu.memory_space<vmem>>, %arg6: memref<128x128xf32, #tpu.memory_space<vmem>>, %arg7: memref<1x128xf32, #tpu.memory_space<vmem>>, %arg8: memref<32x128xf32, #tpu.memory_space<vmem>>) attributes {dimension_semantics = [#tpu.dimension_semantics<parallel>], iteration_bounds = array<i64: 2>, scalar_prefetch = 0 : i64, scratch_operands = 0 : i64, tpu.core_type = #tpu.core_type<tc>, window_params = [{transform_indices = @transform_0, window_bounds = array<i64: 32, 32>}, {pipeline_mode = #tpu.pipeline_mode<synchronous>, transform_indices = @transform_1, window_bounds = array<i64: 32, 128>}, {pipeline_mode = #tpu.pipeline_mode<synchronous>, transform_indices = @transform_2, window_bounds = array<i64: 1, 128>}, {pipeline_mode = #tpu.pipeline_mode<synchronous>, transform_indices = @transform_3, window_bounds = array<i64: 128, 128>}, {pipeline_mode = #tpu.pipeline_mode<synchronous>, transform_indices = @transform_4, window_bounds = array<i64: 1, 128>}, {pipeline_mode = #tpu.pipeline_mode<synchronous>, transform_indices = @transform_5, window_bounds = array<i64: 128, 128>}, {pipeline_mode = #tpu.pipeline_mode<synchronous>, transform_indices = @transform_6, window_bounds = array<i64: 1, 128>}, {transform_indices = @transform_7, window_bounds = array<i64: 32, 128>}]} {
    %c0 = arith.constant 0 : index
    %c0_0 = arith.constant 0 : index
    %0 = vector.load %arg1[%c0, %c0_0] : memref<32x32xf32, #tpu.memory_space<vmem>>, vector<32x32xf32>
    %c0_1 = arith.constant 0 : index
    %c0_2 = arith.constant 0 : index
    %1 = vector.load %arg2[%c0_1, %c0_2] : memref<32x128xf32, #tpu.memory_space<vmem>>, vector<32x128xf32>
    %cst = arith.constant dense<0.000000e+00> : vector<32x128xf32>
    %2 = tpu.matmul %0, %1, %cst {dimension_numbers = #tpu.dot_dimension_numbers<[1], [0], [0], [1], [0, 0, 1, 1], [], []>} : vector<32x32xf32>, vector<32x128xf32>, vector<32x128xf32> -> vector<32x128xf32>
    %c0_3 = arith.constant 0 : index
    %c0_4 = arith.constant 0 : index
    %3 = vector.load %arg3[%c0_3, %c0_4] : memref<1x128xf32, #tpu.memory_space<vmem>>, vector<1x128xf32>
    %4 = vector.broadcast %3 : vector<1x128xf32> to vector<32x128xf32>
    %5 = arith.addf %2, %4 : vector<32x128xf32>
    %cst_5 = arith.constant 0.000000e+00 : f32
    %6 = vector.broadcast %cst_5 : f32 to vector<32x128xf32>
    %7 = arith.maximumf %5, %6 : vector<32x128xf32>
    %c0_6 = arith.constant 0 : index
    %c0_7 = arith.constant 0 : index
    %8 = vector.load %arg4[%c0_6, %c0_7] : memref<128x128xf32, #tpu.memory_space<vmem>>, vector<128x128xf32>
    %cst_8 = arith.constant dense<0.000000e+00> : vector<32x128xf32>
    %9 = tpu.matmul %7, %8, %cst_8 {dimension_numbers = #tpu.dot_dimension_numbers<[1], [0], [0], [1], [0, 0, 1, 1], [], []>} : vector<32x128xf32>, vector<128x128xf32>, vector<32x128xf32> -> vector<32x128xf32>
    %c0_9 = arith.constant 0 : index
    %c0_10 = arith.constant 0 : index
    %10 = vector.load %arg5[%c0_9, %c0_10] : memref<1x128xf32, #tpu.memory_space<vmem>>, vector<1x128xf32>
    %11 = vector.broadcast %10 : vector<1x128xf32> to vector<32x128xf32>
    %12 = arith.addf %9, %11 : vector<32x128xf32>
    %cst_11 = arith.constant 0.000000e+00 : f32
    %13 = vector.broadcast %cst_11 : f32 to vector<32x128xf32>
    %14 = arith.maximumf %12, %13 : vector<32x128xf32>
    %c0_12 = arith.constant 0 : index
    %c0_13 = arith.constant 0 : index
    %15 = vector.load %arg6[%c0_12, %c0_13] : memref<128x128xf32, #tpu.memory_space<vmem>>, vector<128x128xf32>
    %cst_14 = arith.constant dense<0.000000e+00> : vector<32x128xf32>
    %16 = tpu.matmul %14, %15, %cst_14 {dimension_numbers = #tpu.dot_dimension_numbers<[1], [0], [0], [1], [0, 0, 1, 1], [], []>} : vector<32x128xf32>, vector<128x128xf32>, vector<32x128xf32> -> vector<32x128xf32>
    %c0_15 = arith.constant 0 : index
    %c0_16 = arith.constant 0 : index
    %17 = vector.load %arg7[%c0_15, %c0_16] : memref<1x128xf32, #tpu.memory_space<vmem>>, vector<1x128xf32>
    %18 = vector.broadcast %17 : vector<1x128xf32> to vector<32x128xf32>
    %19 = arith.addf %16, %18 : vector<32x128xf32>
    %c0_17 = arith.constant 0 : index
    %c0_18 = arith.constant 0 : index
    %20 = vector.load %arg8[%c0_17, %c0_18] : memref<32x128xf32, #tpu.memory_space<vmem>>, vector<32x128xf32>
    tpu.vector_store %arg8[%c0_17, %c0_18], %19 {strides = array<i32>} : memref<32x128xf32, #tpu.memory_space<vmem>>, vector<32x128xf32>,
    return
  }
  func.func @transform_0(%arg0: i32) -> (i32, i32) {
    %c0_i32 = arith.constant 0 : i32
    %c0_i32_0 = arith.constant 0 : i32
    return %arg0, %c0_i32 : i32, i32
  }
  func.func @transform_1(%arg0: i32) -> (i32, i32) {
    %c0_i32 = arith.constant 0 : i32
    %c0_i32_0 = arith.constant 0 : i32
    %c0_i32_1 = arith.constant 0 : i32
    return %c0_i32, %c0_i32_0 : i32, i32
  }
  func.func @transform_2(%arg0: i32) -> (i32, i32) {
    %c0_i32 = arith.constant 0 : i32
    %c0_i32_0 = arith.constant 0 : i32
    %c0_i32_1 = arith.constant 0 : i32
    return %c0_i32, %c0_i32_0 : i32, i32
  }
  func.func @transform_3(%arg0: i32) -> (i32, i32) {
    %c0_i32 = arith.constant 0 : i32
    %c0_i32_0 = arith.constant 0 : i32
    %c0_i32_1 = arith.constant 0 : i32
    return %c0_i32, %c0_i32_0 : i32, i32
  }
  func.func @transform_4(%arg0: i32) -> (i32, i32) {
    %c0_i32 = arith.constant 0 : i32
    %c0_i32_0 = arith.constant 0 : i32
    %c0_i32_1 = arith.constant 0 : i32
    return %c0_i32, %c0_i32_0 : i32, i32
  }
  func.func @transform_5(%arg0: i32) -> (i32, i32) {
    %c0_i32 = arith.constant 0 : i32
    %c0_i32_0 = arith.constant 0 : i32
    %c0_i32_1 = arith.constant 0 : i32
    return %c0_i32, %c0_i32_0 : i32, i32
  }
  func.func @transform_6(%arg0: i32) -> (i32, i32) {
    %c0_i32 = arith.constant 0 : i32
    %c0_i32_0 = arith.constant 0 : i32
    %c0_i32_1 = arith.constant 0 : i32
    return %c0_i32, %c0_i32_0 : i32, i32
  }
  func.func @transform_7(%arg0: i32) -> (i32, i32) {
    %c0_i32 = arith.constant 0 : i32
    %c0_i32_0 = arith.constant 0 : i32
    return %arg0, %c0_i32 : i32, i32
  }
}

module attributes {stable_mosaic.version = 11 : i64} {
  func.func @_mlp_readout_kernel(%arg0: i32, %arg1: memref<32x32xf32, #tpu.memory_space<vmem>>, %arg2: memref<32x128xf32, #tpu.memory_space<vmem>>, %arg3: memref<1x128xf32, #tpu.memory_space<vmem>>, %arg4: memref<128x128xf32, #tpu.memory_space<vmem>>, %arg5: memref<1x128xf32, #tpu.memory_space<vmem>>, %arg6: memref<128x128xf32, #tpu.memory_space<vmem>>, %arg7: memref<1x128xf32, #tpu.memory_space<vmem>>, %arg8: memref<32x128xf32, #tpu.memory_space<vmem>>) attributes {dimension_semantics = [#tpu.dimension_semantics<parallel>], iteration_bounds = array<i64: 2>, scalar_prefetch = 0 : i64, scratch_operands = 0 : i64, tpu.core_type = #tpu.core_type<tc>, window_params = [{transform_indices = @transform_0, window_bounds = array<i64: 32, 32>}, {pipeline_mode = #tpu.pipeline_mode<synchronous>, transform_indices = @transform_1, window_bounds = array<i64: 32, 128>}, {pipeline_mode = #tpu.pipeline_mode<synchronous>, transform_indices = @transform_2, window_bounds = array<i64: 1, 128>}, {pipeline_mode = #tpu.pipeline_mode<synchronous>, transform_indices = @transform_3, window_bounds = array<i64: 128, 128>}, {pipeline_mode = #tpu.pipeline_mode<synchronous>, transform_indices = @transform_4, window_bounds = array<i64: 1, 128>}, {pipeline_mode = #tpu.pipeline_mode<synchronous>, transform_indices = @transform_5, window_bounds = array<i64: 128, 128>}, {pipeline_mode = #tpu.pipeline_mode<synchronous>, transform_indices = @transform_6, window_bounds = array<i64: 1, 128>}, {transform_indices = @transform_7, window_bounds = array<i64: 32, 128>}]} {
    %c0 = arith.constant 0 : index
    %c0_0 = arith.constant 0 : index
    %0 = vector.load %arg1[%c0, %c0_0] : memref<32x32xf32, #tpu.memory_space<vmem>>, vector<32x32xf32>
    %c0_1 = arith.constant 0 : index
    %c0_2 = arith.constant 0 : index
    %1 = vector.load %arg2[%c0_1, %c0_2] : memref<32x128xf32, #tpu.memory_space<vmem>>, vector<32x128xf32>
    %cst = arith.constant dense<0.000000e+00> : vector<32x128xf32>
    %2 = tpu.matmul %0, %1, %cst {dimension_numbers = #tpu.dot_dimension_numbers<[1], [0], [0], [1], [0, 0, 1, 1], [], []>} : vector<32x32xf32>, vector<32x128xf32>, vector<32x128xf32> -> vector<32x128xf32>
    %c0_3 = arith.constant 0 : index
    %c0_4 = arith.constant 0 : index
    %3 = vector.load %arg3[%c0_3, %c0_4] : memref<1x128xf32, #tpu.memory_space<vmem>>, vector<1x128xf32>
    %4 = vector.broadcast %3 : vector<1x128xf32> to vector<32x128xf32>
    %5 = arith.addf %2, %4 : vector<32x128xf32>
    %cst_5 = arith.constant 0.000000e+00 : f32
    %6 = vector.broadcast %cst_5 : f32 to vector<32x128xf32>
    %7 = arith.maximumf %5, %6 : vector<32x128xf32>
    %c0_6 = arith.constant 0 : index
    %c0_7 = arith.constant 0 : index
    %8 = vector.load %arg4[%c0_6, %c0_7] : memref<128x128xf32, #tpu.memory_space<vmem>>, vector<128x128xf32>
    %cst_8 = arith.constant dense<0.000000e+00> : vector<32x128xf32>
    %9 = tpu.matmul %7, %8, %cst_8 {dimension_numbers = #tpu.dot_dimension_numbers<[1], [0], [0], [1], [0, 0, 1, 1], [], []>} : vector<32x128xf32>, vector<128x128xf32>, vector<32x128xf32> -> vector<32x128xf32>
    %c0_9 = arith.constant 0 : index
    %c0_10 = arith.constant 0 : index
    %10 = vector.load %arg5[%c0_9, %c0_10] : memref<1x128xf32, #tpu.memory_space<vmem>>, vector<1x128xf32>
    %11 = vector.broadcast %10 : vector<1x128xf32> to vector<32x128xf32>
    %12 = arith.addf %9, %11 : vector<32x128xf32>
    %cst_11 = arith.constant 0.000000e+00 : f32
    %13 = vector.broadcast %cst_11 : f32 to vector<32x128xf32>
    %14 = arith.maximumf %12, %13 : vector<32x128xf32>
    %c0_12 = arith.constant 0 : index
    %c0_13 = arith.constant 0 : index
    %15 = vector.load %arg6[%c0_12, %c0_13] : memref<128x128xf32, #tpu.memory_space<vmem>>, vector<128x128xf32>
    %cst_14 = arith.constant dense<0.000000e+00> : vector<32x128xf32>
    %16 = tpu.matmul %14, %15, %cst_14 {dimension_numbers = #tpu.dot_dimension_numbers<[1], [0], [0], [1], [0, 0, 1, 1], [], []>} : vector<32x128xf32>, vector<128x128xf32>, vector<32x128xf32> -> vector<32x128xf32>
    %c0_15 = arith.constant 0 : index
    %c0_16 = arith.constant 0 : index
    %17 = vector.load %arg7[%c0_15, %c0_16] : memref<1x128xf32, #tpu.memory_space<vmem>>, vector<1x128xf32>
    %18 = vector.broadcast %17 : vector<1x128xf32> to vector<32x128xf32>
    %19 = arith.addf %16, %18 : vector<32x128xf32>
    %c0_17 = arith.constant 0 : index
    %c0_18 = arith.constant 0 : index
    %20 = vector.load %arg8[%c0_17, %c0_18] : memref<32x128xf32, #tpu.memory_space<vmem>>, vector<32x128xf32>
    tpu.vector_store %arg8[%c0_17, %c0_18], %19 {strides = array<i32>} : memref<32x128xf32, #tpu.memory_space<vmem>>, vector<32x128xf32>,
    return
  }
  func.func @transform_0(%arg0: i32) -> (i32, i32) {
    %c0_i32 = arith.constant 0 : i32
    %c0_i32_0 = arith.constant 0 : i32
    return %arg0, %c0_i32 : i32, i32
  }
  func.func @transform_1(%arg0: i32) -> (i32, i32) {
    %c0_i32 = arith.constant 0 : i32
    %c0_i32_0 = arith.constant 0 : i32
    %c0_i32_1 = arith.constant 0 : i32
    return %c0_i32, %c0_i32_0 : i32, i32
  }
  func.func @transform_2(%arg0: i32) -> (i32, i32) {
    %c0_i32 = arith.constant 0 : i32
    %c0_i32_0 = arith.constant 0 : i32
    %c0_i32_1 = arith.constant 0 : i32
    return %c0_i32, %c0_i32_0 : i32, i32
  }
  func.func @transform_3(%arg0: i32) -> (i32, i32) {
    %c0_i32 = arith.constant 0 : i32
    %c0_i32_0 = arith.constant 0 : i32
    %c0_i32_1 = arith.constant 0 : i32
    return %c0_i32, %c0_i32_0 : i32, i32
  }
  func.func @transform_4(%arg0: i32) -> (i32, i32) {
    %c0_i32 = arith.constant 0 : i32
    %c0_i32_0 = arith.constant 0 : i32
    %c0_i32_1 = arith.constant 0 : i32
    return %c0_i32, %c0_i32_0 : i32, i32
  }
  func.func @transform_5(%arg0: i32) -> (i32, i32) {
    %c0_i32 = arith.constant 0 : i32
    %c0_i32_0 = arith.constant 0 : i32
    %c0_i32_1 = arith.constant 0 : i32
    return %c0_i32, %c0_i32_0 : i32, i32
  }
  func.func @transform_6(%arg0: i32) -> (i32, i32) {
    %c0_i32 = arith.constant 0 : i32
    %c0_i32_0 = arith.constant 0 : i32
    %c0_i32_1 = arith.constant 0 : i32
    return %c0_i32, %c0_i32_0 : i32, i32
  }
  func.func @transform_7(%arg0: i32) -> (i32, i32) {
    %c0_i32 = arith.constant 0 : i32
    %c0_i32_0 = arith.constant 0 : i32
    return %arg0, %c0_i32 : i32, i32
  }
}

</mosaic_0001>

<bundles_post_ra>
// kernel: _mlp_readout_impl.1
= control target key start
LH: loop header
LB: loop body
LE: loop exit
PB: predicated region body
PF: predicated region fallthrough
CT: control target
= control target key end

     0   :  { %12 = vsyncpa [#allocation3], 0  ;;  %s1137_s0 = inlined_call_operand.vmem [shape: f32[64,32], index: 0, kind: input, shape index: {}]   ;;  %s1138_s1 = inlined_call_operand.vmem [shape: f32[32,128], index: 1, kind: input, shape index: {}]   ;;  %s1139_s2 = inlined_call_operand.vmem [shape: f32[1,128], index: 2, kind: input, shape index: {}]   ;;  %s1140_s3 = inlined_call_operand.hbm [shape: f32[128,128], index: 3, kind: input, shape index: {}]   ;;  %s1141_s4 = inlined_call_operand.vmem [shape: f32[1,128], index: 4, kind: input, shape index: {}]   ;;  %s1142_s5 = inlined_call_operand.hbm [shape: f32[128,128], index: 5, kind: input, shape index: {}]   ;;  %s1143_s6 = inlined_call_operand.vmem [shape: f32[1,128], index: 6, kind: input, shape index: {}]   ;;  %s1144_s7 = inlined_call_operand.vmem [shape: f32[64,128], index: 7, kind: output, shape index: {}]  }
   0x1   :  { %13 = vsyncpa [#allocation5], 0  ;;  %s1034_s24 = smov 0  }
   0x2 LB: > { %s731_s25 = sadd.s32 4294967295, %s988_s24   ;;  %p733_p0 = scmp.ge.s32.totalorder %s988_s24, 1  ;;  %s988_s24 = sphi %s1034_s24, %s19_s24  }
   0x3   : > { %p202_p1 = scmp.lt.s32.totalorder %s988_s24, 3  ;;  %s990_s26 = smov [#allocation2]  }
   0x4   : > { %s220_s27 = sshll.u32 %s990_s26, 4  ;;  %p1048_p3 = scmp.eq.s32.totalorder %s731_s25, 0  ;;  %s221_s27 = int_to_ptr.vmem [resolvable:$true] %s220_s27 }
   0x5   : > { %p1042_p2 = pnand %p733_p0, %p202_p1  ;;  %s991_s30 = smov [#allocation4]  }
   0x6   : > { %s236_s8 = sshll.u32 %s991_s30, 4  ;;  %s933_s10 = scalar_lea.vmem %s221_s27, 2048  ;;  %s237_s8 = int_to_ptr.vmem [resolvable:$true] %s236_s8 }
   0x7   : > { %p899_p4 = pneg %p1042_p2  ;;  %p934_p7 = scmp.ne.s32.totalorder %s221_s27, %s933_s10 }
   0x8   : > { %p941_p10 = scmp.lt.s32.totalorder %s221_s27, %s221_s27  ;;  %p942_p11 = scmp.lt.s32.totalorder %s933_s10, %s933_s10 }
   0x9   : > { %p1056_p5 = pnand %p1048_p3, %p899_p4 }
   0xa   : > { %p943_p12 = por %p942_p11, %p941_p10 }
   0xb   : > { %p924_p6 = pneg %p1056_p5 }
   0xd   : > { %p936_p8 = pnand %p934_p7, %p924_p6 }
   0xf   : > { %p937_p9 = pneg %p936_p8 }
  0x11   : > { %p944_p13 = pnand %p943_p12, %p937_p9 }
  0x13   : > { %947 = shalt.err (!%p944_p13)
}
  0x14   : > { %s992_s11 = smov 128   ;;  %s993_s12 = smov 8  }
  0x15   : > { %902 = dma.hbm_to_vmem [thread:$0]  (!%p1056_p5), %s1140_s3, 2048, %s221_s27, [#allocation3], %s992_s11, %s992_s11, %s993_s12  }
  0x16   : > { %s959_s15 = scalar_lea.vmem %s237_s8, 2048  ;;  %p967_p7 = scmp.lt.s32.totalorder %s237_s8, %s237_s8 }
  0x17   : > { %p960_p0 = scmp.ne.s32.totalorder %s237_s8, %s959_s15  ;;  %p968_p8 = scmp.lt.s32.totalorder %s959_s15, %s959_s15 }
  0x19   : > { %p962_p1 = pnand %p960_p0, %p924_p6  ;;  %p969_p10 = por %p968_p8, %p967_p7 }
  0x1b   : > { %p963_p4 = pneg %p962_p1 }
  0x1d   : > { %p970_p9 = pnand %p969_p10, %p963_p4 }
  0x1f   : > { %973 = shalt.err (!%p970_p9)
}
  0x20   : > { %905 = dma.hbm_to_vmem [thread:$0]  (!%p1056_p5), %s1142_s5, 2048, %s237_s8, [#allocation5], %s992_s11, %s992_s11, %s993_s12  }
  0x21   : > { %264 = sbr.rel (%p1042_p2) target bundleno = 652 (0x28c), region = 48 }
  0x26   : > { %979 = dma.done.wait (%p1048_p3), [#allocation3], 2048  }
  0x27   : > { %981 = vsyncadd (%p1048_p3), [#allocation3], 4294965248 }
  0x28   : > { %983 = dma.done.wait (%p1048_p3), [#allocation5], 2048  }
  0x29   : > { %985 = vsyncadd (%p1048_p3), [#allocation5], 4294965248  ;;  %s740_s18 = sshll.u32 %s731_s25, 2  ;;  %vm327_vm0 = vcmask 261120   ;;  %v319_v0 = vld [vmem:[%s1138_s1 + $0x18] sm:$0xff]  ;;  %v318_v1 = vld [vmem:[%s1138_s1 + $0x10] sm:$0xff] }
  0x2a   : > { %p301_p6 = scmp.lt.s32.totalorder %s740_s18, 7  ;;  %801 = vmatprep.subr.mxu0 %v319_v0  ;;  %v317_v3 = vld [vmem:[%s1138_s1 + $0x8] sm:$0xff]  ;;  %v444_v4 = vld [vmem:[#allocation2 + $0x78] sm:$0xff]  ;;  %v443_v5 = vld [vmem:[#allocation2 + $0x70] sm:$0xff] }
  0x2b   : > { %802 = vmatpush3.msra.mxu0 %v319_v0  ;;  %815 = vmatprep.subr.mxu1 %v444_v4  ;;  %v316_v6 = vld [vmem:[%s1138_s1] sm:$0xff]  ;;  %v442_v7 = vld [vmem:[#allocation2 + $0x68] sm:$0xff]  ;;  %v440_v11 = vld [vmem:[#allocation2 + $0x58] sm:$0xff] }
  0x2c   : > { %s1149_s18 = smov (!%p301_p6, %s740_s18), 7  ;;  %803 = vmatprep.subr.mxu0 %v318_v1  ;;  %816 = vmatpush3.msra.mxu1 %v444_v4  ;;  %v441_v9 = vld [vmem:[#allocation2 + $0x60] sm:$0xff]  ;;  %v439_v13 = vld [vmem:[#allocation2 + $0x50] sm:$0xff]  ;;  %v438_v14 = vld [vmem:[#allocation2 + $0x48] sm:$0xff] }
  0x2d   : > { %s741_s19 = sshll.u32 %s1149_s18, 3  ;;  %804 = vmatpush3.msra.mxu0 %v318_v1  ;;  %817 = vmatprep.subr.mxu1 %v443_v5  ;;  %v437_v15 = vld [vmem:[#allocation2 + $0x40] sm:$0xff]  ;;  %v436_v16 = vld [vmem:[#allocation2 + $0x38] sm:$0xff]  ;;  %v435_v17 = vld [vmem:[#allocation2 + $0x30] sm:$0xff] }
  0x2e   : > { %s1098_s22 = scalar_lea.vmem %s1137_s0, %s741_s19  ;;  %805 = vmatprep.subr.mxu0 %v317_v3  ;;  %818 = vmatpush3.msra.mxu1 %v443_v5  ;;  %v434_v18 = vld [vmem:[#allocation2 + $0x28] sm:$0xff]  ;;  %v433_v19 = vld [vmem:[#allocation2 + $0x20] sm:$0xff]  ;;  %v432_v20 = vld [vmem:[#allocation2 + $0x18] sm:$0xff]  ;;  %s310_s17 = scalar_lea.vmem %s1144_s7, %s741_s19 }
  0x2f   : > { %v312_v2 = vld [vmem:[%s1098_s22] sm:$0xff]  ;;  %806 = vmatpush3.msra.mxu0 %v317_v3  ;;  %v313_v8 = vld [vmem:[%s1098_s22 + $0x8] sm:$0xff]  ;;  %v314_v10 = vld [vmem:[%s1098_s22 + $0x10] sm:$0xff]  ;;  %819 = vmatprep.subr.mxu1 %v442_v7 }
  0x30   : > { %809 = vmatprep.mubr.msk.f32.mxu0 %vm327_vm0, %v312_v2  ;;  %807 = vmatprep.subr.mxu0 %v316_v6  ;;  %v315_v12 = vld [vmem:[%s1098_s22 + $0x18] sm:$0xff]  ;;  %v431_v21 = vld [vmem:[#allocation2 + $0x10] sm:$0xff]  ;;  %v430_v22 = vld [vmem:[#allocation2 + $0x8] sm:$0xff] }
  0x31   : > { %808 = vmatpush3.msra.mxu0 %v316_v6  ;;  %820 = vmatpush3.msra.mxu1 %v442_v7  ;;  %v429_v23 = vld [vmem:[#allocation2] sm:$0xff]  ;;  %v556_v24 = vld [vmem:[#allocation4 + $0x78] sm:$0xff]  ;;  %v555_v25 = vld [vmem:[#allocation4 + $0x70] sm:$0xff] }
  0x32   : > { %810 = vmatmul.mubr.msk.f32.vlgmr.msra.gmra.mxu0 %vm327_vm0, %v313_v8  ;;  %821 = vmatprep.subr.mxu1 %v441_v9  ;;  %v554_v26 = vld [vmem:[#allocation4 + $0x68] sm:$0xff]  ;;  %v553_v27 = vld [vmem:[#allocation4 + $0x60] sm:$0xff]  ;;  %v552_v28 = vld [vmem:[#allocation4 + $0x58] sm:$0xff] }
  0x33   : > { %812 = vmatprep.mubr.msk.f32.mxu0 %vm327_vm0, %v314_v10  ;;  %822 = vmatpush3.msra.mxu1 %v441_v9  ;;  %v551_v29 = vld [vmem:[#allocation4 + $0x50] sm:$0xff]  ;;  %v550_v30 = vld [vmem:[#allocation4 + $0x48] sm:$0xff]  ;;  %v549_v31 = vld [vmem:[#allocation4 + $0x40] sm:$0xff] }
  0x34   : > { %823 = vmatprep.subr.mxu1 %v440_v11  ;;  %853 = vmatprep.subr.mxu0 %v556_v24  ;;  %v548_v32 = vld [vmem:[#allocation4 + $0x38] sm:$0xff]  ;;  %v547_v33 = vld [vmem:[#allocation4 + $0x30] sm:$0xff]  ;;  %v546_v34 = vld [vmem:[#allocation4 + $0x28] sm:$0xff] }
  0x35   : > { %824 = vmatpush3.msra.mxu1 %v440_v11  ;;  %854 = vmatpush3.msra.mxu0 %v556_v24  ;;  %v545_v35 = vld [vmem:[#allocation4 + $0x20] sm:$0xff]  ;;  %v544_v49 = vld [vmem:[#allocation4 + $0x18] sm:$0xff]  ;;  %v543_v50 = vld [vmem:[#allocation4 + $0x10] sm:$0xff] }
  0x36   : > { %813 = vmatmul.mubr.msk.f32.gmra.mxu0 %vm327_vm0, %v315_v12  ;;  %825 = vmatprep.subr.mxu1 %v439_v13  ;;  %v744_v36 = vld [vmem:[%s1139_s2] ss:$0 sm:$0xff]  ;;  %v542_v51 = vld [vmem:[#allocation4 + $0x8] sm:$0xff] }
  0x37   : > { %826 = vmatpush3.msra.mxu1 %v439_v13  ;;  %855 = vmatprep.subr.mxu0 %v555_v25  ;;  %v541_v52 = vld [vmem:[#allocation4] sm:$0xff] }
  0x38   : > { %827 = vmatprep.subr.mxu1 %v438_v14  ;;  %856 = vmatpush3.msra.mxu0 %v555_v25  ;;  %v749_v53 = vld [vmem:[%s1141_s4] ss:$0 sm:$0xff] }
  0x39   : > { %828 = vmatpush3.msra.mxu1 %v438_v14  ;;  %857 = vmatprep.subr.mxu0 %v554_v26  ;;  %v750_v3 = vld [vmem:[%s1143_s6] ss:$0 sm:$0xff] }
  0x3a   : > { %829 = vmatprep.subr.mxu1 %v437_v15  ;;  %858 = vmatpush3.msra.mxu0 %v554_v26 }
  0x3b   : > { %830 = vmatpush3.msra.mxu1 %v437_v15  ;;  %859 = vmatprep.subr.mxu0 %v553_v27 }
  0x3c   : > { %831 = vmatprep.subr.mxu1 %v436_v16  ;;  %860 = vmatpush3.msra.mxu0 %v553_v27 }
  0x3d   : > { %832 = vmatpush3.msra.mxu1 %v436_v16  ;;  %861 = vmatprep.subr.mxu0 %v552_v28 }
  0x3e   : > { %833 = vmatprep.subr.mxu1 %v435_v17  ;;  %862 = vmatpush3.msra.mxu0 %v552_v28 }
  0x3f   : > { %834 = vmatpush3.msra.mxu1 %v435_v17  ;;  %863 = vmatprep.subr.mxu0 %v551_v29 }
  0x40   : > { %835 = vmatprep.subr.mxu1 %v434_v18  ;;  %864 = vmatpush3.msra.mxu0 %v551_v29 }
  0x41   : > { %836 = vmatpush3.msra.mxu1 %v434_v18  ;;  %865 = vmatprep.subr.mxu0 %v550_v30 }
  0x42   : > { %837 = vmatprep.subr.mxu1 %v433_v19  ;;  %866 = vmatpush3.msra.mxu0 %v550_v30 }
  0x43   : > { %838 = vmatpush3.msra.mxu1 %v433_v19  ;;  %867 = vmatprep.subr.mxu0 %v549_v31 }
  0x44   : > { %839 = vmatprep.subr.mxu1 %v432_v20  ;;  %868 = vmatpush3.msra.mxu0 %v549_v31 }
  0x45   : > { %840 = vmatpush3.msra.mxu1 %v432_v20  ;;  %869 = vmatprep.subr.mxu0 %v548_v32 }
  0x46   : > { %841 = vmatprep.subr.mxu1 %v431_v21  ;;  %870 = vmatpush3.msra.mxu0 %v548_v32 }
  0x47   : > { %842 = vmatpush3.msra.mxu1 %v431_v21  ;;  %871 = vmatprep.subr.mxu0 %v547_v33 }
  0x48   : > { %843 = vmatprep.subr.mxu1 %v430_v22  ;;  %872 = vmatpush3.msra.mxu0 %v547_v33 }
  0x49   : > { %844 = vmatpush3.msra.mxu1 %v430_v22  ;;  %873 = vmatprep.subr.mxu0 %v546_v34 }
  0x4a   : > { %845 = vmatprep.subr.mxu1 %v429_v23  ;;  %874 = vmatpush3.msra.mxu0 %v546_v34 }
  0x4b   : > { %846 = vmatpush3.msra.mxu1 %v429_v23  ;;  %875 = vmatprep.subr.mxu0 %v545_v35 }
  0x4c   : > { %876 = vmatpush3.msra.mxu0 %v545_v35 }
  0x4d   : > { %877 = vmatprep.subr.mxu0 %v544_v49 }
  0x4e   : > { %878 = vmatpush3.msra.mxu0 %v544_v49 }
  0x4f   : > { %879 = vmatprep.subr.mxu0 %v543_v50 }
  0x50   : > { %880 = vmatpush3.msra.mxu0 %v543_v50 }
  0x51   : > { %881 = vmatprep.subr.mxu0 %v542_v51 }
  0x52   : > { %882 = vmatpush3.msra.mxu0 %v542_v51 }
  0x53   : > { %883 = vmatprep.subr.mxu0 %v541_v52 }
  0x54   : > { %884 = vmatpush3.msra.mxu0 %v541_v52 }
  0xf2   : > { %v811_v37 = vpop.f32.mrf.mxu0 }
  0xf3   : > { %v412_v38 = vadd.f32 %v811_v37, %v744_v36 }
  0xf4   : > { %v406_v39 = vpop.f32.mrf.mxu0 }
  0xf5   : > { %v407_v40 = vadd.f32 %v744_v36, %v406_v39  ;;  %v426_v43 = vmax.f32 %v412_v38, 0.0 }
  0xf6   : > { %v814_v41 = vpop.f32.mrf.mxu0 }
  0xf7   : > { %v425_v42 = vmax.f32 %v407_v40, 0.0  ;;  %v422_v44 = vadd.f32 %v814_v41, %v744_v36 }
  0xf8   : > { %v416_v45 = vpop.f32.mrf.mxu0 }
  0xf9   : > { %v417_v46 = vadd.f32 %v744_v36, %v416_v45  ;;  %847 = vmatprep.mubr.f32.mxu1 %v425_v42  ;;  %v428_v48 = vmax.f32 %v422_v44, 0.0 }
  0xfa   : > { %848 = vmatmul.mubr.f32.vlgmr.msra.gmra.mxu1 %v426_v43 }
  0xfb   : > { %v427_v47 = vmax.f32 %v417_v46, 0.0 }
  0xfd   : > { %850 = vmatprep.mubr.f32.mxu1 %v427_v47 }
  0xfe   : > { %851 = vmatmul.mubr.f32.gmra.mxu1 %v428_v48 }
 0x1ba   : > { %v849_v54 = vpop.f32.mrf.mxu1 }
 0x1bb   : > { %v524_v55 = vadd.f32 %v849_v54, %v749_v53 }
 0x1bc   : > { %v518_v56 = vpop.f32.mrf.mxu1 }
 0x1bd   : > { %v519_v57 = vadd.f32 %v749_v53, %v518_v56  ;;  %v538_v60 = vmax.f32 %v524_v55, 0.0 }
 0x1be   : > { %v852_v58 = vpop.f32.mrf.mxu1 }
 0x1bf   : > { %v537_v59 = vmax.f32 %v519_v57, 0.0  ;;  %v534_v61 = vadd.f32 %v852_v58, %v749_v53 }
 0x1c0   : > { %v528_v62 = vpop.f32.mrf.mxu1 }
 0x1c1   : > { %v529_v63 = vadd.f32 %v749_v53, %v528_v62  ;;  %885 = vmatprep.mubr.f32.mxu0 %v537_v59  ;;  %v540_v1 = vmax.f32 %v534_v61, 0.0 }
 0x1c2   : > { %886 = vmatmul.mubr.f32.vlgmr.msra.gmra.mxu0 %v538_v60 }
 0x1c3   : > { %v539_v0 = vmax.f32 %v529_v63, 0.0 }
 0x1c5   : > { %888 = vmatprep.mubr.f32.mxu0 %v539_v0 }
 0x1c6   : > { %889 = vmatmul.mubr.f32.gmra.mxu0 %v540_v1 }
 0x282   : > { %v887_v2 = vpop.f32.mrf.mxu0 }
 0x283   : > { %v636_v6 = vadd.f32 %v887_v2, %v750_v3 }
 0x284   : > { %v630_v4 = vpop.f32.mrf.mxu0 }
 0x285   : > { %v631_v5 = vadd.f32 %v750_v3, %v630_v4  ;;  %650 = vst [vmem:[%s310_s17 + $0x8] sm:$0xff] %v636_v6 }
 0x286   : > { %v890_v7 = vpop.f32.mrf.mxu0 }
 0x287   : > { %649 = vst [vmem:[%s310_s17] sm:$0xff] %v631_v5  ;;  %v646_v10 = vadd.f32 %v890_v7, %v750_v3 }
 0x288   : > { %v640_v8 = vpop.f32.mrf.mxu0 }
 0x289   : > { %v641_v9 = vadd.f32 %v750_v3, %v640_v8  ;;  %652 = vst [vmem:[%s310_s17 + $0x18] sm:$0xff] %v646_v10 }
 0x28b   : > { %651 = vst [vmem:[%s310_s17 + $0x10] sm:$0xff] %v641_v9 }
 0x28c PF: > { %s19_s24 = sadd.s32 1, %s988_s24  }
 0x28d   : > { %p16_p2 = scmp.ge.s32.totalorder %s19_s24, 4  }
 0x28f   :  { %18 = sbr.rel (!%p16_p2) target bundleno = 2 (0x2), region = 87 }
 0x294   :  { %675 = vsyncpa [#allocation3], 1 }
 0x295   :  { %677 = vsyncpa [#allocation3 + $0x1], 1 }
 0x296   :  { %678 = vsyncpa [#allocation5], 1 }

// kernel: _mlp_readout_impl.1
= control target key start
LH: loop header
LB: loop body
LE: loop exit
PB: predicated region body
PF: predicated region fallthrough
CT: control target
= control target key end

     0   :  { %12 = vsyncpa [#allocation3], 0  ;;  %s1137_s0 = inlined_call_operand.vmem [shape: f32[64,32], index: 0, kind: input, shape index: {}]   ;;  %s1138_s1 = inlined_call_operand.vmem [shape: f32[32,128], index: 1, kind: input, shape index: {}]   ;;  %s1139_s2 = inlined_call_operand.vmem [shape: f32[1,128], index: 2, kind: input, shape index: {}]   ;;  %s1140_s3 = inlined_call_operand.hbm [shape: f32[128,128], index: 3, kind: input, shape index: {}]   ;;  %s1141_s4 = inlined_call_operand.vmem [shape: f32[1,128], index: 4, kind: input, shape index: {}]   ;;  %s1142_s5 = inlined_call_operand.hbm [shape: f32[128,128], index: 5, kind: input, shape index: {}]   ;;  %s1143_s6 = inlined_call_operand.vmem [shape: f32[1,128], index: 6, kind: input, shape index: {}]   ;;  %s1144_s7 = inlined_call_operand.vmem [shape: f32[64,128], index: 7, kind: output, shape index: {}]  }
   0x1   :  { %13 = vsyncpa [#allocation5], 0  ;;  %s1034_s24 = smov 0  }
   0x2 LB: > { %s731_s25 = sadd.s32 4294967295, %s988_s24   ;;  %p733_p0 = scmp.ge.s32.totalorder %s988_s24, 1  ;;  %s988_s24 = sphi %s1034_s24, %s19_s24  }
   0x3   : > { %p202_p1 = scmp.lt.s32.totalorder %s988_s24, 3  ;;  %s990_s26 = smov [#allocation2]  }
   0x4   : > { %s220_s27 = sshll.u32 %s990_s26, 4  ;;  %p1048_p3 = scmp.eq.s32.totalorder %s731_s25, 0  ;;  %s221_s27 = int_to_ptr.vmem [resolvable:$true] %s220_s27 }
   0x5   : > { %p1042_p2 = pnand %p733_p0, %p202_p1  ;;  %s991_s30 = smov [#allocation4]  }
   0x6   : > { %s236_s8 = sshll.u32 %s991_s30, 4  ;;  %s933_s10 = scalar_lea.vmem %s221_s27, 2048  ;;  %s237_s8 = int_to_ptr.vmem [resolvable:$true] %s236_s8 }
   0x7   : > { %p899_p4 = pneg %p1042_p2  ;;  %p934_p7 = scmp.ne.s32.totalorder %s221_s27, %s933_s10 }
   0x8   : > { %p941_p10 = scmp.lt.s32.totalorder %s221_s27, %s221_s27  ;;  %p942_p11 = scmp.lt.s32.totalorder %s933_s10, %s933_s10 }
   0x9   : > { %p1056_p5 = pnand %p1048_p3, %p899_p4 }
   0xa   : > { %p943_p12 = por %p942_p11, %p941_p10 }
   0xb   : > { %p924_p6 = pneg %p1056_p5 }
   0xd   : > { %p936_p8 = pnand %p934_p7, %p924_p6 }
   0xf   : > { %p937_p9 = pneg %p936_p8 }
  0x11   : > { %p944_p13 = pnand %p943_p12, %p937_p9 }
  0x13   : > { %947 = shalt.err (!%p944_p13)
}
  0x14   : > { %s992_s11 = smov 128   ;;  %s993_s12 = smov 8  }
  0x15   : > { %902 = dma.hbm_to_vmem [thread:$0]  (!%p1056_p5), %s1140_s3, 2048, %s221_s27, [#allocation3], %s992_s11, %s992_s11, %s993_s12  }
  0x16   : > { %s959_s15 = scalar_lea.vmem %s237_s8, 2048  ;;  %p967_p7 = scmp.lt.s32.totalorder %s237_s8, %s237_s8 }
  0x17   : > { %p960_p0 = scmp.ne.s32.totalorder %s237_s8, %s959_s15  ;;  %p968_p8 = scmp.lt.s32.totalorder %s959_s15, %s959_s15 }
  0x19   : > { %p962_p1 = pnand %p960_p0, %p924_p6  ;;  %p969_p10 = por %p968_p8, %p967_p7 }
  0x1b   : > { %p963_p4 = pneg %p962_p1 }
  0x1d   : > { %p970_p9 = pnand %p969_p10, %p963_p4 }
  0x1f   : > { %973 = shalt.err (!%p970_p9)
}
  0x20   : > { %905 = dma.hbm_to_vmem [thread:$0]  (!%p1056_p5), %s1142_s5, 2048, %s237_s8, [#allocation5], %s992_s11, %s992_s11, %s993_s12  }
  0x21   : > { %264 = sbr.rel (%p1042_p2) target bundleno = 652 (0x28c), region = 48 }
  0x26   : > { %979 = dma.done.wait (%p1048_p3), [#allocation3], 2048  }
  0x27   : > { %981 = vsyncadd (%p1048_p3), [#allocation3], 4294965248 }
  0x28   : > { %983 = dma.done.wait (%p1048_p3), [#allocation5], 2048  }
  0x29   : > { %985 = vsyncadd (%p1048_p3), [#allocation5], 4294965248  ;;  %s740_s18 = sshll.u32 %s731_s25, 2  ;;  %vm327_vm0 = vcmask 261120   ;;  %v319_v0 = vld [vmem:[%s1138_s1 + $0x18] sm:$0xff]  ;;  %v318_v1 = vld [vmem:[%s1138_s1 + $0x10] sm:$0xff] }
  0x2a   : > { %p301_p6 = scmp.lt.s32.totalorder %s740_s18, 7  ;;  %801 = vmatprep.subr.mxu0 %v319_v0  ;;  %v317_v3 = vld [vmem:[%s1138_s1 + $0x8] sm:$0xff]  ;;  %v444_v4 = vld [vmem:[#allocation2 + $0x78] sm:$0xff]  ;;  %v443_v5 = vld [vmem:[#allocation2 + $0x70] sm:$0xff] }
  0x2b   : > { %802 = vmatpush3.msra.mxu0 %v319_v0  ;;  %815 = vmatprep.subr.mxu1 %v444_v4  ;;  %v316_v6 = vld [vmem:[%s1138_s1] sm:$0xff]  ;;  %v442_v7 = vld [vmem:[#allocation2 + $0x68] sm:$0xff]  ;;  %v440_v11 = vld [vmem:[#allocation2 + $0x58] sm:$0xff] }
  0x2c   : > { %s1149_s18 = smov (!%p301_p6, %s740_s18), 7  ;;  %803 = vmatprep.subr.mxu0 %v318_v1  ;;  %816 = vmatpush3.msra.mxu1 %v444_v4  ;;  %v441_v9 = vld [vmem:[#allocation2 + $0x60] sm:$0xff]  ;;  %v439_v13 = vld [vmem:[#allocation2 + $0x50] sm:$0xff]  ;;  %v438_v14 = vld [vmem:[#allocation2 + $0x48] sm:$0xff] }
  0x2d   : > { %s741_s19 = sshll.u32 %s1149_s18, 3  ;;  %804 = vmatpush3.msra.mxu0 %v318_v1  ;;  %817 = vmatprep.subr.mxu1 %v443_v5  ;;  %v437_v15 = vld [vmem:[#allocation2 + $0x40] sm:$0xff]  ;;  %v436_v16 = vld [vmem:[#allocation2 + $0x38] sm:$0xff]  ;;  %v435_v17 = vld [vmem:[#allocation2 + $0x30] sm:$0xff] }
  0x2e   : > { %s1098_s22 = scalar_lea.vmem %s1137_s0, %s741_s19  ;;  %805 = vmatprep.subr.mxu0 %v317_v3  ;;  %818 = vmatpush3.msra.mxu1 %v443_v5  ;;  %v434_v18 = vld [vmem:[#allocation2 + $0x28] sm:$0xff]  ;;  %v433_v19 = vld [vmem:[#allocation2 + $0x20] sm:$0xff]  ;;  %v432_v20 = vld [vmem:[#allocation2 + $0x18] sm:$0xff]  ;;  %s310_s17 = scalar_lea.vmem %s1144_s7, %s741_s19 }
  0x2f   : > { %v312_v2 = vld [vmem:[%s1098_s22] sm:$0xff]  ;;  %806 = vmatpush3.msra.mxu0 %v317_v3  ;;  %v313_v8 = vld [vmem:[%s1098_s22 + $0x8] sm:$0xff]  ;;  %v314_v10 = vld [vmem:[%s1098_s22 + $0x10] sm:$0xff]  ;;  %819 = vmatprep.subr.mxu1 %v442_v7 }
  0x30   : > { %809 = vmatprep.mubr.msk.f32.mxu0 %vm327_vm0, %v312_v2  ;;  %807 = vmatprep.subr.mxu0 %v316_v6  ;;  %v315_v12 = vld [vmem:[%s1098_s22 + $0x18] sm:$0xff]  ;;  %v431_v21 = vld [vmem:[#allocation2 + $0x10] sm:$0xff]  ;;  %v430_v22 = vld [vmem:[#allocation2 + $0x8] sm:$0xff] }
  0x31   : > { %808 = vmatpush3.msra.mxu0 %v316_v6  ;;  %820 = vmatpush3.msra.mxu1 %v442_v7  ;;  %v429_v23 = vld [vmem:[#allocation2] sm:$0xff]  ;;  %v556_v24 = vld [vmem:[#allocation4 + $0x78] sm:$0xff]  ;;  %v555_v25 = vld [vmem:[#allocation4 + $0x70] sm:$0xff] }
  0x32   : > { %810 = vmatmul.mubr.msk.f32.vlgmr.msra.gmra.mxu0 %vm327_vm0, %v313_v8  ;;  %821 = vmatprep.subr.mxu1 %v441_v9  ;;  %v554_v26 = vld [vmem:[#allocation4 + $0x68] sm:$0xff]  ;;  %v553_v27 = vld [vmem:[#allocation4 + $0x60] sm:$0xff]  ;;  %v552_v28 = vld [vmem:[#allocation4 + $0x58] sm:$0xff] }
  0x33   : > { %812 = vmatprep.mubr.msk.f32.mxu0 %vm327_vm0, %v314_v10  ;;  %822 = vmatpush3.msra.mxu1 %v441_v9  ;;  %v551_v29 = vld [vmem:[#allocation4 + $0x50] sm:$0xff]  ;;  %v550_v30 = vld [vmem:[#allocation4 + $0x48] sm:$0xff]  ;;  %v549_v31 = vld [vmem:[#allocation4 + $0x40] sm:$0xff] }
  0x34   : > { %823 = vmatprep.subr.mxu1 %v440_v11  ;;  %853 = vmatprep.subr.mxu0 %v556_v24  ;;  %v548_v32 = vld [vmem:[#allocation4 + $0x38] sm:$0xff]  ;;  %v547_v33 = vld [vmem:[#allocation4 + $0x30] sm:$0xff]  ;;  %v546_v34 = vld [vmem:[#allocation4 + $0x28] sm:$0xff] }
  0x35   : > { %824 = vmatpush3.msra.mxu1 %v440_v11  ;;  %854 = vmatpush3.msra.mxu0 %v556_v24  ;;  %v545_v35 = vld [vmem:[#allocation4 + $0x20] sm:$0xff]  ;;  %v544_v49 = vld [vmem:[#allocation4 + $0x18] sm:$0xff]  ;;  %v543_v50 = vld [vmem:[#allocation4 + $0x10] sm:$0xff] }
  0x36   : > { %813 = vmatmul.mubr.msk.f32.gmra.mxu0 %vm327_vm0, %v315_v12  ;;  %825 = vmatprep.subr.mxu1 %v439_v13  ;;  %v744_v36 = vld [vmem:[%s1139_s2] ss:$0 sm:$0xff]  ;;  %v542_v51 = vld [vmem:[#allocation4 + $0x8] sm:$0xff] }
  0x37   : > { %826 = vmatpush3.msra.mxu1 %v439_v13  ;;  %855 = vmatprep.subr.mxu0 %v555_v25  ;;  %v541_v52 = vld [vmem:[#allocation4] sm:$0xff] }
  0x38   : > { %827 = vmatprep.subr.mxu1 %v438_v14  ;;  %856 = vmatpush3.msra.mxu0 %v555_v25  ;;  %v749_v53 = vld [vmem:[%s1141_s4] ss:$0 sm:$0xff] }
  0x39   : > { %828 = vmatpush3.msra.mxu1 %v438_v14  ;;  %857 = vmatprep.subr.mxu0 %v554_v26  ;;  %v750_v3 = vld [vmem:[%s1143_s6] ss:$0 sm:$0xff] }
  0x3a   : > { %829 = vmatprep.subr.mxu1 %v437_v15  ;;  %858 = vmatpush3.msra.mxu0 %v554_v26 }
  0x3b   : > { %830 = vmatpush3.msra.mxu1 %v437_v15  ;;  %859 = vmatprep.subr.mxu0 %v553_v27 }
  0x3c   : > { %831 = vmatprep.subr.mxu1 %v436_v16  ;;  %860 = vmatpush3.msra.mxu0 %v553_v27 }
  0x3d   : > { %832 = vmatpush3.msra.mxu1 %v436_v16  ;;  %861 = vmatprep.subr.mxu0 %v552_v28 }
  0x3e   : > { %833 = vmatprep.subr.mxu1 %v435_v17  ;;  %862 = vmatpush3.msra.mxu0 %v552_v28 }
  0x3f   : > { %834 = vmatpush3.msra.mxu1 %v435_v17  ;;  %863 = vmatprep.subr.mxu0 %v551_v29 }
  0x40   : > { %835 = vmatprep.subr.mxu1 %v434_v18  ;;  %864 = vmatpush3.msra.mxu0 %v551_v29 }
  0x41   : > { %836 = vmatpush3.msra.mxu1 %v434_v18  ;;  %865 = vmatprep.subr.mxu0 %v550_v30 }
  0x42   : > { %837 = vmatprep.subr.mxu1 %v433_v19  ;;  %866 = vmatpush3.msra.mxu0 %v550_v30 }
  0x43   : > { %838 = vmatpush3.msra.mxu1 %v433_v19  ;;  %867 = vmatprep.subr.mxu0 %v549_v31 }
  0x44   : > { %839 = vmatprep.subr.mxu1 %v432_v20  ;;  %868 = vmatpush3.msra.mxu0 %v549_v31 }
  0x45   : > { %840 = vmatpush3.msra.mxu1 %v432_v20  ;;  %869 = vmatprep.subr.mxu0 %v548_v32 }
  0x46   : > { %841 = vmatprep.subr.mxu1 %v431_v21  ;;  %870 = vmatpush3.msra.mxu0 %v548_v32 }
  0x47   : > { %842 = vmatpush3.msra.mxu1 %v431_v21  ;;  %871 = vmatprep.subr.mxu0 %v547_v33 }
  0x48   : > { %843 = vmatprep.subr.mxu1 %v430_v22  ;;  %872 = vmatpush3.msra.mxu0 %v547_v33 }
  0x49   : > { %844 = vmatpush3.msra.mxu1 %v430_v22  ;;  %873 = vmatprep.subr.mxu0 %v546_v34 }
  0x4a   : > { %845 = vmatprep.subr.mxu1 %v429_v23  ;;  %874 = vmatpush3.msra.mxu0 %v546_v34 }
  0x4b   : > { %846 = vmatpush3.msra.mxu1 %v429_v23  ;;  %875 = vmatprep.subr.mxu0 %v545_v35 }
  0x4c   : > { %876 = vmatpush3.msra.mxu0 %v545_v35 }
  0x4d   : > { %877 = vmatprep.subr.mxu0 %v544_v49 }
  0x4e   : > { %878 = vmatpush3.msra.mxu0 %v544_v49 }
  0x4f   : > { %879 = vmatprep.subr.mxu0 %v543_v50 }
  0x50   : > { %880 = vmatpush3.msra.mxu0 %v543_v50 }
  0x51   : > { %881 = vmatprep.subr.mxu0 %v542_v51 }
  0x52   : > { %882 = vmatpush3.msra.mxu0 %v542_v51 }
  0x53   : > { %883 = vmatprep.subr.mxu0 %v541_v52 }
  0x54   : > { %884 = vmatpush3.msra.mxu0 %v541_v52 }
  0xf2   : > { %v811_v37 = vpop.f32.mrf.mxu0 }
  0xf3   : > { %v412_v38 = vadd.f32 %v811_v37, %v744_v36 }
  0xf4   : > { %v406_v39 = vpop.f32.mrf.mxu0 }
  0xf5   : > { %v407_v40 = vadd.f32 %v744_v36, %v406_v39  ;;  %v426_v43 = vmax.f32 %v412_v38, 0.0 }
  0xf6   : > { %v814_v41 = vpop.f32.mrf.mxu0 }
  0xf7   : > { %v425_v42 = vmax.f32 %v407_v40, 0.0  ;;  %v422_v44 = vadd.f32 %v814_v41, %v744_v36 }
  0xf8   : > { %v416_v45 = vpop.f32.mrf.mxu0 }
  0xf9   : > { %v417_v46 = vadd.f32 %v744_v36, %v416_v45  ;;  %847 = vmatprep.mubr.f32.mxu1 %v425_v42  ;;  %v428_v48 = vmax.f32 %v422_v44, 0.0 }
  0xfa   : > { %848 = vmatmul.mubr.f32.vlgmr.msra.gmra.mxu1 %v426_v43 }
  0xfb   : > { %v427_v47 = vmax.f32 %v417_v46, 0.0 }
  0xfd   : > { %850 = vmatprep.mubr.f32.mxu1 %v427_v47 }
  0xfe   : > { %851 = vmatmul.mubr.f32.gmra.mxu1 %v428_v48 }
 0x1ba   : > { %v849_v54 = vpop.f32.mrf.mxu1 }
 0x1bb   : > { %v524_v55 = vadd.f32 %v849_v54, %v749_v53 }
 0x1bc   : > { %v518_v56 = vpop.f32.mrf.mxu1 }
 0x1bd   : > { %v519_v57 = vadd.f32 %v749_v53, %v518_v56  ;;  %v538_v60 = vmax.f32 %v524_v55, 0.0 }
 0x1be   : > { %v852_v58 = vpop.f32.mrf.mxu1 }
 0x1bf   : > { %v537_v59 = vmax.f32 %v519_v57, 0.0  ;;  %v534_v61 = vadd.f32 %v852_v58, %v749_v53 }
 0x1c0   : > { %v528_v62 = vpop.f32.mrf.mxu1 }
 0x1c1   : > { %v529_v63 = vadd.f32 %v749_v53, %v528_v62  ;;  %885 = vmatprep.mubr.f32.mxu0 %v537_v59  ;;  %v540_v1 = vmax.f32 %v534_v61, 0.0 }
 0x1c2   : > { %886 = vmatmul.mubr.f32.vlgmr.msra.gmra.mxu0 %v538_v60 }
 0x1c3   : > { %v539_v0 = vmax.f32 %v529_v63, 0.0 }
 0x1c5   : > { %888 = vmatprep.mubr.f32.mxu0 %v539_v0 }
 0x1c6   : > { %889 = vmatmul.mubr.f32.gmra.mxu0 %v540_v1 }
 0x282   : > { %v887_v2 = vpop.f32.mrf.mxu0 }
 0x283   : > { %v636_v6 = vadd.f32 %v887_v2, %v750_v3 }
 0x284   : > { %v630_v4 = vpop.f32.mrf.mxu0 }
 0x285   : > { %v631_v5 = vadd.f32 %v750_v3, %v630_v4  ;;  %650 = vst [vmem:[%s310_s17 + $0x8] sm:$0xff] %v636_v6 }
 0x286   : > { %v890_v7 = vpop.f32.mrf.mxu0 }
 0x287   : > { %649 = vst [vmem:[%s310_s17] sm:$0xff] %v631_v5  ;;  %v646_v10 = vadd.f32 %v890_v7, %v750_v3 }
 0x288   : > { %v640_v8 = vpop.f32.mrf.mxu0 }
 0x289   : > { %v641_v9 = vadd.f32 %v750_v3, %v640_v8  ;;  %652 = vst [vmem:[%s310_s17 + $0x18] sm:$0xff] %v646_v10 }
 0x28b   : > { %651 = vst [vmem:[%s310_s17 + $0x10] sm:$0xff] %v641_v9 }
 0x28c PF: > { %s19_s24 = sadd.s32 1, %s988_s24  }
 0x28d   : > { %p16_p2 = scmp.ge.s32.totalorder %s19_s24, 4  }
 0x28f   :  { %18 = sbr.rel (!%p16_p2) target bundleno = 2 (0x2), region = 87 }
 0x294   :  { %675 = vsyncpa [#allocation3], 1 }
 0x295   :  { %677 = vsyncpa [#allocation3 + $0x1], 1 }
 0x296   :  { %678 = vsyncpa [#allocation5], 1 }

</bundles_post_ra>
